<compile_context>
chip_gen: v7x
topology: tpu7x:2x2x1
jax: 0.10.0
libtpu: 0.0.40
codegen_flags: <defaults>
</compile_context>

<pallas_src>
import functools

import jax
import jax.numpy as jnp
from jax.experimental import pallas as pl
from jax.experimental.pallas import tpu as pltpu


def _round_up(x: int, m: int) -> int:
    return ((x + m - 1) // m) * m


# ----------------------------------------------------------------------------
# 1-D bilinear (align_corners=True) interpolation matrix.
# ----------------------------------------------------------------------------
def _bilinear_matrix(out_size: int, in_size: int) -> jnp.ndarray:
    """(out_size, in_size) matrix M s.t. y = M @ x is bilinear interp, align_corners=True."""
    if out_size == 1 or in_size == 1:
        src = jnp.zeros((out_size,), jnp.float32)
    else:
        src = jnp.arange(out_size, dtype=jnp.float32) * ((in_size - 1) / (out_size - 1))
    i0 = jnp.clip(jnp.floor(src).astype(jnp.int32), 0, in_size - 1)
    i1 = jnp.clip(i0 + 1, 0, in_size - 1)
    frac = src - i0.astype(jnp.float32)
    cols = jnp.arange(in_size, dtype=jnp.int32)[None, :]
    w0 = (1.0 - frac)[:, None] * (cols == i0[:, None]).astype(jnp.float32)
    w1 = frac[:, None] * (cols == i1[:, None]).astype(jnp.float32)
    return w0 + w1


# ----------------------------------------------------------------------------
# Fused kernel: upsample one row-tile of one batch element and accumulate CE.
# ----------------------------------------------------------------------------
def _fused_upsample_ce_kernel(x_ref, wh_ref, wwt_ref, lab_ref, wvec_ref,
                              num_ref, den_ref, *,
                              num_classes, in_h, ignore_label):
    # Zero the per-batch accumulators at the first row tile.
    @pl.when(pl.program_id(1) == 0)
    def _():
        num_ref[...] = jnp.zeros_like(num_ref)
        den_ref[...] = jnp.zeros_like(den_ref)

    x2d = x_ref[0]        # (C*h, w)   f32 low-res logits of batch n (all classes)
    wh = wh_ref[...]      # (TH, h)    row-interp rows for this tile
    wwt = wwt_ref[...]    # (w, W)     col-interp matrix (already transposed)
    lab = lab_ref[0]      # (TH, W)    int32 labels for this tile

    # Column interpolation for all classes at once on the MXU: (C*h, w) @ (w, W).
    y = jnp.dot(x2d, wwt, preferred_element_type=jnp.float32)   # (C*h, W)

    def up_plane(c):
        # Row interpolation of class c: (TH, h) @ (h, W) -> (TH, W).
        return jnp.dot(wh, y[c * in_h:(c + 1) * in_h, :],
                       preferred_element_type=jnp.float32)

    # Online log-softmax + target gather over classes (single pass, no one-hot).
    z = up_plane(0)                       # (TH, W)
    m = z                                 # running max
    s = jnp.ones_like(z)                  # running sum(exp(z - m))
    sel = lab == 0
    tgt = jnp.where(sel, z, 0.0)          # logit of the target class
    twt = jnp.where(sel, wvec_ref[0], 0.0)  # class weight of the target class

    for c in range(1, num_classes):
        z = up_plane(c)
        m_new = jnp.maximum(m, z)
        s = s * jnp.exp(m - m_new) + jnp.exp(z - m_new)
        m = m_new
        sel = lab == c
        tgt = jnp.where(sel, z, tgt)
        twt = jnp.where(sel, wvec_ref[c], twt)

    valid = lab != ignore_label           # also masks padded label rows
    lse = m + jnp.log(s)
    loss = jnp.where(valid, twt * (lse - tgt), 0.0)   # (TH, W)
    den = jnp.where(valid, twt, 0.0)                  # (TH, W)

    loss_sum = jnp.sum(jnp.sum(loss, axis=1, keepdims=True), axis=0, keepdims=True)
    den_sum = jnp.sum(jnp.sum(den, axis=1, keepdims=True), axis=0, keepdims=True)
    num_ref[0] = num_ref[0] + loss_sum
    den_ref[0] = den_ref[0] + den_sum


# ----------------------------------------------------------------------------
# Module-equivalent wrapper.
# ----------------------------------------------------------------------------
def upsample_ce(logit, label, weight=None, ignore_label=255, tile_rows=128):
    """logit: (N, C, h, w) float; label: (N, H, W) int. Returns scalar loss.

    When (h, w) == (H, W) the interpolation matrices are identity, so the
    fused kernel reproduces the module's no-upsample branch exactly.
    """
    N, C, h, w = logit.shape
    H, W = int(label.shape[1]), int(label.shape[2])

    if weight is None:
        weight = jnp.ones((C,), jnp.float32)
    weight = jnp.asarray(weight, jnp.float32).reshape(C)

    # Row tiling of the output/label height (TH multiple of 8; labels padded
    # with ignore_label if H is ragged -- labels are small int32 so this is cheap).
    n_tiles = pl.cdiv(H, tile_rows)
    tile_h = _round_up(pl.cdiv(H, n_tiles), 8)
    h_pad = tile_h * n_tiles

    wh = _bilinear_matrix(H, h)                       # (H, h)
    if h_pad != H:
        wh = jnp.pad(wh, ((0, h_pad - H), (0, 0)))
    wwt = _bilinear_matrix(W, w).T                    # (w, W)

    lab = label.astype(jnp.int32)
    if h_pad != H:
        lab = jnp.pad(lab, ((0, 0), (0, h_pad - H), (0, 0)),
                      constant_values=ignore_label)

    # Free, contiguous reshape: all class planes of one batch element form a
    # single (C*h, w) matmul operand.
    x2d = logit.astype(jnp.float32).reshape(N, C * h, w)

    kernel = functools.partial(
        _fused_upsample_ce_kernel,
        num_classes=C, in_h=h, ignore_label=ignore_label)

    num, den = pl.pallas_call(
        kernel,
        out_shape=(
            jax.ShapeDtypeStruct((N, 1, 1), jnp.float32),
            jax.ShapeDtypeStruct((N, 1, 1), jnp.float32),
        ),
        grid_spec=pltpu.PrefetchScalarGridSpec(
            num_scalar_prefetch=0,
            grid=(N, h_pad // tile_h),
            in_specs=[
                # low-res logits of batch n: constant block across r -> fetched once per n
                pl.BlockSpec((1, C * h, w), lambda n, r: (n, 0, 0)),
                # row-interp rows for this tile
                pl.BlockSpec((tile_h, h), lambda n, r: (r, 0)),
                # col-interp matrix: constant -> fetched once
                pl.BlockSpec((w, W), lambda n, r: (0, 0)),
                # label tile
                pl.BlockSpec((1, tile_h, W), lambda n, r: (n, r, 0)),
                # class weights as SMEM scalars
                pl.BlockSpec(memory_space=pltpu.MemorySpace.SMEM),
            ],
            out_specs=(
                pl.BlockSpec((1, 1, 1), lambda n, r: (n, 0, 0)),
                pl.BlockSpec((1, 1, 1), lambda n, r: (n, 0, 0)),
            ),
        ),
        compiler_params=pltpu.CompilerParams(
            dimension_semantics=("parallel", "arbitrary")),
    )(x2d, wh, wwt, lab, weight)

    # reduction='mean' with class weights => sum(w_t * nll) / sum(w_t)
    return jnp.sum(num) / jnp.sum(den)


# ----------------------------------------------------------------------------
# Pure-JAX reference (correctness sanity check).
# ----------------------------------------------------------------------------
def _reference(logit, label, weight, ignore_label):
    N, C, h, w = logit.shape
    H, W = label.shape[1], label.shape[2]
    wh = _bilinear_matrix(H, h)
    ww = _bilinear_matrix(W, w)
    up = jnp.einsum("Hh,nchw,Ww->ncHW", wh, logit.astype(jnp.float32), ww)
    logp = jax.nn.log_softmax(up, axis=1)
    valid = (label != ignore_label).astype(jnp.float32)
    lab_safe = jnp.where(label != ignore_label, label, 0)
    nll = -jnp.take_along_axis(logp, lab_safe[:, None], axis=1)[:, 0]
    wt = weight[lab_safe] * valid
    return jnp.sum(nll * wt) / jnp.sum(wt)


if __name__ == "__main__":
    key = jax.random.PRNGKey(0)
    k1, k2, k3 = jax.random.split(key, 3)

    N, C, h, w = 2, 4, 16, 16
    H, W = 32, 32  # label resolution (logits get upsampled 16 -> 32)

    logit = jax.random.normal(k1, (N, C, h, w), dtype=jnp.float32)
    label = jax.random.randint(k2, (N, H, W), 0, C, dtype=jnp.int32)
    ignore_mask = jax.random.bernoulli(k3, 0.1, (N, H, W))
    label = jnp.where(ignore_mask, 255, label)
    weight = jnp.array([0.5, 1.0, 1.5, 2.0], dtype=jnp.float32)

    loss = upsample_ce(logit, label, weight=weight, ignore_label=255)
    loss = jax.block_until_ready(loss)

    ref = _reference(logit, label, weight, 255)
    if not jnp.allclose(loss, ref, rtol=2e-3, atol=2e-3):
        raise AssertionError(f"mismatch: pallas={float(loss)} ref={float(ref)}")

    print("KERNEL_OK")
</pallas_src>

<mosaic_0001>
module attributes {stable_mosaic.version = 11 : i64} {
  func.func @_fused_upsample_ce_kernel(%arg0: i32, %arg1: i32, %arg2: memref<1x64x16xf32, #tpu.memory_space<vmem>>, %arg3: memref<32x16xf32, #tpu.memory_space<vmem>>, %arg4: memref<16x32xf32, #tpu.memory_space<vmem>>, %arg5: memref<1x32x32xi32, #tpu.memory_space<vmem>>, %arg6: memref<4xf32, #tpu.memory_space<smem>>, %arg7: memref<1x1x1xf32, #tpu.memory_space<vmem>>, %arg8: memref<1x1x1xf32, #tpu.memory_space<vmem>>) attributes {dimension_semantics = [#tpu.dimension_semantics<parallel>, #tpu.dimension_semantics<arbitrary>], iteration_bounds = array<i64: 2, 1>, scalar_prefetch = 0 : i64, scratch_operands = 0 : i64, tpu.core_type = #tpu.core_type<tc>, window_params = [{transform_indices = @transform_0, window_bounds = array<i64: 1, 64, 16>}, {transform_indices = @transform_1, window_bounds = array<i64: 32, 16>}, {pipeline_mode = #tpu.pipeline_mode<synchronous>, transform_indices = @transform_2, window_bounds = array<i64: 16, 32>}, {transform_indices = @transform_3, window_bounds = array<i64: 1, 32, 32>}, {transform_indices = @transform_4, window_bounds = array<i64: 4>}, {transform_indices = @transform_5, window_bounds = array<i64: 1, 1, 1>}, {transform_indices = @transform_6, window_bounds = array<i64: 1, 1, 1>}]} {
    %c0_i32 = arith.constant 0 : i32
    %0 = arith.cmpi eq, %arg1, %c0_i32 : i32
    %1 = arith.extui %0 : i1 to i32
    %c0_i32_0 = arith.constant 0 : i32
    %2 = arith.cmpi ne, %1, %c0_i32_0 : i32
    scf.if %2 {
      %cst_37 = arith.constant 0.000000e+00 : f32
      %96 = vector.broadcast %cst_37 : f32 to vector<1x1x1xf32>
      %c0_38 = arith.constant 0 : index
      %c0_39 = arith.constant 0 : index
      %c0_40 = arith.constant 0 : index
      %97 = vector.load %arg7[%c0_38, %c0_39, %c0_40] : memref<1x1x1xf32, #tpu.memory_space<vmem>>, vector<1x1x1xf32>
      tpu.vector_store %arg7[%c0_38, %c0_39, %c0_40], %96 {strides = array<i32>} : memref<1x1x1xf32, #tpu.memory_space<vmem>>, vector<1x1x1xf32>,
      %cst_41 = arith.constant 0.000000e+00 : f32
      %98 = vector.broadcast %cst_41 : f32 to vector<1x1x1xf32>
      %c0_42 = arith.constant 0 : index
      %c0_43 = arith.constant 0 : index
      %c0_44 = arith.constant 0 : index
      %99 = vector.load %arg8[%c0_42, %c0_43, %c0_44] : memref<1x1x1xf32, #tpu.memory_space<vmem>>, vector<1x1x1xf32>
      tpu.vector_store %arg8[%c0_42, %c0_43, %c0_44], %98 {strides = array<i32>} : memref<1x1x1xf32, #tpu.memory_space<vmem>>, vector<1x1x1xf32>,
    } else {
    }
    %c0 = arith.constant 0 : index
    %c0_1 = arith.constant 0 : index
    %c0_2 = arith.constant 0 : index
    %3 = vector.load %arg2[%c0, %c0_1, %c0_2] : memref<1x64x16xf32, #tpu.memory_space<vmem>>, vector<1x64x16xf32>
    %4 = vector.shape_cast %3 : vector<1x64x16xf32> to vector<64x16xf32>
    %c0_3 = arith.constant 0 : index
    %c0_4 = arith.constant 0 : index
    %5 = vector.load %arg3[%c0_3, %c0_4] : memref<32x16xf32, #tpu.memory_space<vmem>>, vector<32x16xf32>
    %c0_5 = arith.constant 0 : index
    %c0_6 = arith.constant 0 : index
    %6 = vector.load %arg4[%c0_5, %c0_6] : memref<16x32xf32, #tpu.memory_space<vmem>>, vector<16x32xf32>
    %c0_7 = arith.constant 0 : index
    %c0_8 = arith.constant 0 : index
    %c0_9 = arith.constant 0 : index
    %7 = vector.load %arg5[%c0_7, %c0_8, %c0_9] : memref<1x32x32xi32, #tpu.memory_space<vmem>>, vector<1x32x32xi32>
    %8 = vector.shape_cast %7 : vector<1x32x32xi32> to vector<32x32xi32>
    %cst = arith.constant dense<0.000000e+00> : vector<64x32xf32>
    %9 = tpu.matmul %4, %6, %cst {dimension_numbers = #tpu.dot_dimension_numbers<[1], [0], [0], [1], [0, 0, 1, 1], [], []>} : vector<64x16xf32>, vector<16x32xf32>, vector<64x32xf32> -> vector<64x32xf32>
    %10 = vector.extract_strided_slice %9 {offsets = [0, 0], sizes = [16, 32], strides = [1, 1]} : vector<64x32xf32> to vector<16x32xf32>
    %cst_10 = arith.constant dense<0.000000e+00> : vector<32x32xf32>
    %11 = tpu.matmul %5, %10, %cst_10 {dimension_numbers = #tpu.dot_dimension_numbers<[1], [0], [0], [1], [0, 0, 1, 1], [], []>} : vector<32x16xf32>, vector<16x32xf32>, vector<32x32xf32> -> vector<32x32xf32>
    %cst_11 = arith.constant 1.000000e+00 : f32
    %12 = vector.broadcast %cst_11 : f32 to vector<32x32xf32>
    %c0_i32_12 = arith.constant 0 : i32
    %13 = vector.broadcast %c0_i32_12 : i32 to vector<32x32xi32>
    %14 = arith.cmpi eq, %8, %13 : vector<32x32xi32>
    %cst_13 = arith.constant 0.000000e+00 : f32
    %15 = vector.broadcast %cst_13 : f32 to vector<32x32xf32>
    %16 = arith.select %14, %11, %15 : vector<32x32xi1>, vector<32x32xf32>
    %c0_14 = arith.constant 0 : index
    %17 = memref.load %arg6[%c0_14] : memref<4xf32, #tpu.memory_space<smem>>
    %cst_15 = arith.constant 0.000000e+00 : f32
    %18 = vector.broadcast %17 : f32 to vector<32x32xf32>
    %19 = vector.broadcast %cst_15 : f32 to vector<32x32xf32>
    %20 = arith.select %14, %18, %19 : vector<32x32xi1>, vector<32x32xf32>
    %21 = vector.extract_strided_slice %9 {offsets = [16, 0], sizes = [16, 32], strides = [1, 1]} : vector<64x32xf32> to vector<16x32xf32>
    %cst_16 = arith.constant dense<0.000000e+00> : vector<32x32xf32>
    %22 = tpu.matmul %5, %21, %cst_16 {dimension_numbers = #tpu.dot_dimension_numbers<[1], [0], [0], [1], [0, 0, 1, 1], [], []>} : vector<32x16xf32>, vector<16x32xf32>, vector<32x32xf32> -> vector<32x32xf32>
    %23 = arith.maximumf %11, %22 : vector<32x32xf32>
    %24 = arith.subf %11, %23 : vector<32x32xf32>
    %25 = math.exp %24 : vector<32x32xf32>
    %26 = arith.mulf %12, %25 : vector<32x32xf32>
    %27 = arith.subf %22, %23 : vector<32x32xf32>
    %28 = math.exp %27 : vector<32x32xf32>
    %29 = arith.addf %26, %28 : vector<32x32xf32>
    %c1_i32 = arith.constant 1 : i32
    %30 = vector.broadcast %c1_i32 : i32 to vector<32x32xi32>
    %31 = arith.cmpi eq, %8, %30 : vector<32x32xi32>
    %32 = arith.select %31, %22, %16 : vector<32x32xi1>, vector<32x32xf32>
    %c1 = arith.constant 1 : index
    %33 = memref.load %arg6[%c1] : memref<4xf32, #tpu.memory_space<smem>>
    %34 = vector.broadcast %33 : f32 to vector<32x32xf32>
    %35 = arith.select %31, %34, %20 : vector<32x32xi1>, vector<32x32xf32>
    %36 = vector.extract_strided_slice %9 {offsets = [32, 0], sizes = [16, 32], strides = [1, 1]} : vector<64x32xf32> to vector<16x32xf32>
    %cst_17 = arith.constant dense<0.000000e+00> : vector<32x32xf32>
    %37 = tpu.matmul %5, %36, %cst_17 {dimension_numbers = #tpu.dot_dimension_numbers<[1], [0], [0], [1], [0, 0, 1, 1], [], []>} : vector<32x16xf32>, vector<16x32xf32>, vector<32x32xf32> -> vector<32x32xf32>
    %38 = arith.maximumf %23, %37 : vector<32x32xf32>
    %39 = arith.subf %23, %38 : vector<32x32xf32>
    %40 = math.exp %39 : vector<32x32xf32>
    %41 = arith.mulf %29, %40 : vector<32x32xf32>
    %42 = arith.subf %37, %38 : vector<32x32xf32>
    %43 = math.exp %42 : vector<32x32xf32>
    %44 = arith.addf %41, %43 : vector<32x32xf32>
    %c2_i32 = arith.constant 2 : i32
    %45 = vector.broadcast %c2_i32 : i32 to vector<32x32xi32>
    %46 = arith.cmpi eq, %8, %45 : vector<32x32xi32>
    %47 = arith.select %46, %37, %32 : vector<32x32xi1>, vector<32x32xf32>
    %c2 = arith.constant 2 : index
    %48 = memref.load %arg6[%c2] : memref<4xf32, #tpu.memory_space<smem>>
    %49 = vector.broadcast %48 : f32 to vector<32x32xf32>
    %50 = arith.select %46, %49, %35 : vector<32x32xi1>, vector<32x32xf32>
    %51 = vector.extract_strided_slice %9 {offsets = [48, 0], sizes = [16, 32], strides = [1, 1]} : vector<64x32xf32> to vector<16x32xf32>
    %cst_18 = arith.constant dense<0.000000e+00> : vector<32x32xf32>
    %52 = tpu.matmul %5, %51, %cst_18 {dimension_numbers = #tpu.dot_dimension_numbers<[1], [0], [0], [1], [0, 0, 1, 1], [], []>} : vector<32x16xf32>, vector<16x32xf32>, vector<32x32xf32> -> vector<32x32xf32>
    %53 = arith.maximumf %38, %52 : vector<32x32xf32>
    %54 = arith.subf %38, %53 : vector<32x32xf32>
    %55 = math.exp %54 : vector<32x32xf32>
    %56 = arith.mulf %44, %55 : vector<32x32xf32>
    %57 = arith.subf %52, %53 : vector<32x32xf32>
    %58 = math.exp %57 : vector<32x32xf32>
    %59 = arith.addf %56, %58 : vector<32x32xf32>
    %c3_i32 = arith.constant 3 : i32
    %60 = vector.broadcast %c3_i32 : i32 to vector<32x32xi32>
    %61 = arith.cmpi eq, %8, %60 : vector<32x32xi32>
    %62 = arith.select %61, %52, %47 : vector<32x32xi1>, vector<32x32xf32>
    %c3 = arith.constant 3 : index
    %63 = memref.load %arg6[%c3] : memref<4xf32, #tpu.memory_space<smem>>
    %64 = vector.broadcast %63 : f32 to vector<32x32xf32>
    %65 = arith.select %61, %64, %50 : vector<32x32xi1>, vector<32x32xf32>
    %c255_i32 = arith.constant 255 : i32
    %66 = vector.broadcast %c255_i32 : i32 to vector<32x32xi32>
    %67 = arith.cmpi ne, %8, %66 : vector<32x32xi32>
    %68 = math.log %59 : vector<32x32xf32>
    %69 = arith.addf %53, %68 : vector<32x32xf32>
    %70 = arith.subf %69, %62 : vector<32x32xf32>
    %71 = arith.mulf %65, %70 : vector<32x32xf32>
    %cst_19 = arith.constant 0.000000e+00 : f32
    %72 = vector.broadcast %cst_19 : f32 to vector<32x32xf32>
    %73 = arith.select %67, %71, %72 : vector<32x32xi1>, vector<32x32xf32>
    %cst_20 = arith.constant 0.000000e+00 : f32
    %74 = vector.broadcast %cst_20 : f32 to vector<32x32xf32>
    %75 = arith.select %67, %65, %74 : vector<32x32xi1>, vector<32x32xf32>
    %cst_21 = arith.constant dense<0.000000e+00> : vector<32xf32>
    %76 = vector.multi_reduction <add>, %73, %cst_21 [1] : vector<32x32xf32> to vector<32xf32>
    %77 = vector.shape_cast %76 : vector<32xf32> to vector<32x1xf32>
    %cst_22 = arith.constant dense<0.000000e+00> : vector<1xf32>
    %78 = vector.multi_reduction <add>, %77, %cst_22 [0] : vector<32x1xf32> to vector<1xf32>
    %79 = vector.shape_cast %78 : vector<1xf32> to vector<1x1xf32>
    %cst_23 = arith.constant dense<0.000000e+00> : vector<32xf32>
    %80 = vector.multi_reduction <add>, %75, %cst_23 [1] : vector<32x32xf32> to vector<32xf32>
    %81 = vector.shape_cast %80 : vector<32xf32> to vector<32x1xf32>
    %cst_24 = arith.constant dense<0.000000e+00> : vector<1xf32>
    %82 = vector.multi_reduction <add>, %81, %cst_24 [0] : vector<32x1xf32> to vector<1xf32>
    %83 = vector.shape_cast %82 : vector<1xf32> to vector<1x1xf32>
    %c0_25 = arith.constant 0 : index
    %c0_26 = arith.constant 0 : index
    %c0_27 = arith.constant 0 : index
    %84 = vector.load %arg7[%c0_25, %c0_26, %c0_27] : memref<1x1x1xf32, #tpu.memory_space<vmem>>, vector<1x1x1xf32>
    %85 = vector.shape_cast %84 : vector<1x1x1xf32> to vector<1x1xf32>
    %86 = arith.addf %85, %79 : vector<1x1xf32>
    %c0_28 = arith.constant 0 : index
    %c0_29 = arith.constant 0 : index
    %c0_30 = arith.constant 0 : index
    %87 = vector.load %arg7[%c0_28, %c0_29, %c0_30] : memref<1x1x1xf32, #tpu.memory_space<vmem>>, vector<1x1x1xf32>
    %88 = vector.shape_cast %87 : vector<1x1x1xf32> to vector<1x1xf32>
    %89 = vector.shape_cast %86 : vector<1x1xf32> to vector<1x1x1xf32>
    tpu.vector_store %arg7[%c0_28, %c0_29, %c0_30], %89 {strides = array<i32>} : memref<1x1x1xf32, #tpu.memory_space<vmem>>, vector<1x1x1xf32>,
    %c0_31 = arith.constant 0 : index
    %c0_32 = arith.constant 0 : index
    %c0_33 = arith.constant 0 : index
    %90 = vector.load %arg8[%c0_31, %c0_32, %c0_33] : memref<1x1x1xf32, #tpu.memory_space<vmem>>, vector<1x1x1xf32>
    %91 = vector.shape_cast %90 : vector<1x1x1xf32> to vector<1x1xf32>
    %92 = arith.addf %91, %83 : vector<1x1xf32>
    %c0_34 = arith.constant 0 : index
    %c0_35 = arith.constant 0 : index
    %c0_36 = arith.constant 0 : index
    %93 = vector.load %arg8[%c0_34, %c0_35, %c0_36] : memref<1x1x1xf32, #tpu.memory_space<vmem>>, vector<1x1x1xf32>
    %94 = vector.shape_cast %93 : vector<1x1x1xf32> to vector<1x1xf32>
    %95 = vector.shape_cast %92 : vector<1x1xf32> to vector<1x1x1xf32>
    tpu.vector_store %arg8[%c0_34, %c0_35, %c0_36], %95 {strides = array<i32>} : memref<1x1x1xf32, #tpu.memory_space<vmem>>, vector<1x1x1xf32>,
    return
  }
  func.func @transform_0(%arg0: i32, %arg1: i32) -> (i32, i32, i32) {
    %c0_i32 = arith.constant 0 : i32
    %c0_i32_0 = arith.constant 0 : i32
    %c0_i32_1 = arith.constant 0 : i32
    return %arg0, %c0_i32, %c0_i32_0 : i32, i32, i32
  }
  func.func @transform_1(%arg0: i32, %arg1: i32) -> (i32, i32) {
    %c0_i32 = arith.constant 0 : i32
    %c0_i32_0 = arith.constant 0 : i32
    return %arg1, %c0_i32 : i32, i32
  }
  func.func @transform_2(%arg0: i32, %arg1: i32) -> (i32, i32) {
    %c0_i32 = arith.constant 0 : i32
    %c0_i32_0 = arith.constant 0 : i32
    %c0_i32_1 = arith.constant 0 : i32
    return %c0_i32, %c0_i32_0 : i32, i32
  }
  func.func @transform_3(%arg0: i32, %arg1: i32) -> (i32, i32, i32) {
    %c0_i32 = arith.constant 0 : i32
    %c0_i32_0 = arith.constant 0 : i32
    return %arg0, %arg1, %c0_i32 : i32, i32, i32
  }
  func.func @transform_4(%arg0: i32, %arg1: i32) -> i32 {
    %c0_i32 = arith.constant 0 : i32
    %c0_i32_0 = arith.constant 0 : i32
    return %c0_i32 : i32
  }
  func.func @transform_5(%arg0: i32, %arg1: i32) -> (i32, i32, i32) {
    %c0_i32 = arith.constant 0 : i32
    %c0_i32_0 = arith.constant 0 : i32
    %c0_i32_1 = arith.constant 0 : i32
    return %arg0, %c0_i32, %c0_i32_0 : i32, i32, i32
  }
  func.func @transform_6(%arg0: i32, %arg1: i32) -> (i32, i32, i32) {
    %c0_i32 = arith.constant 0 : i32
    %c0_i32_0 = arith.constant 0 : i32
    %c0_i32_1 = arith.constant 0 : i32
    return %arg0, %c0_i32, %c0_i32_0 : i32, i32, i32
  }
}

</mosaic_0001>

<bundles_post_ra>
// kernel: tpu_custom_call.1
= control target key start
LH: loop header
LB: loop body
LE: loop exit
PB: predicated region body
PF: predicated region fallthrough
CT: control target
= control target key end

     0   :  { %12 = vsyncpa [#allocation3], 0  ;;  %s1541_s21 = smov 0   ;;  %s1543_s22 = smov 0   ;;  %s1842_s0 = inlined_call_operand.vmem [shape: f32[2,64,16], index: 0, kind: input, shape index: {}]   ;;  %s1843_s1 = inlined_call_operand.vmem [shape: f32[32,16], index: 1, kind: input, shape index: {}]   ;;  %s1844_s2 = inlined_call_operand.vmem [shape: f32[16,32], index: 2, kind: input, shape index: {}]   ;;  %s1845_s3 = inlined_call_operand.vmem [shape: s32[2,32,32], index: 3, kind: input, shape index: {}]   ;;  %s1846_s4 = inlined_call_operand.vmem [shape: f32[4], index: 4, kind: input, shape index: {}]   ;;  %s1847_s5 = inlined_call_operand.vmem [shape: f32[2,1,1], index: 5, kind: output, shape index: {0}]   ;;  %s1848_s6 = inlined_call_operand.vmem [shape: f32[2,1,1], index: 6, kind: output, shape index: {1}]  }
   0x1   :  { %s1545_s23 = smov 0  }
   0x2 LB: > { %s1216_s24 = sadd.s32 4294967295, %s1502_s23   ;;  %s30_s25 = sadd.s32 1, %s1498_s22  ;;  %s1502_s23 = sphi %s1545_s23, %s18_s23   ;;  %s1498_s22 = sphi %s1543_s22, %s1862_s22   ;;  %s1494_s21 = sphi %s1541_s21, %s1861_s21  }
   0x3   : > { %p32_p0 = scmp.ge.s32.totalorder %s30_s25, 2  ;;  %p1218_p1 = scmp.ge.s32.totalorder %s1502_s23, 1 }
   0x4   : > { %p209_p2 = scmp.lt.s32.totalorder %s1502_s23, 3  ;;  %p1566_p4 = scmp.eq.s32.totalorder %s1216_s24, 0 }
   0x5   : > { %s1864_s25 = smov (%p32_p0, %s30_s25), 0  ;;  %s234_s30 = sshll.u32 %s1846_s4, 4  ;;  %s235_s30 = int_to_ptr.vmem [resolvable:$true] %s234_s30 }
   0x6   : > { %p1562_p3 = pnand %p1218_p1, %p209_p2  ;;  %s1461_s7 = scalar_lea.vmem %s235_s30, 16 }
   0x7   : > { %p1462_p7 = scmp.ne.s32.totalorder %s235_s30, %s1461_s7  ;;  %p1469_p11 = scmp.lt.s32.totalorder %s235_s30, %s235_s30 }
   0x8   : > { %p1373_p5 = pneg %p1562_p3  ;;  %p1470_p12 = scmp.lt.s32.totalorder %s1461_s7, %s1461_s7 }
   0xa   : > { %p1374_p6 = pnand %p1566_p4, %p1373_p5  ;;  %p1471_p13 = por %p1470_p12, %p1469_p11 }
   0xc   : > { %p1463_p8 = pneg %p1374_p6 }
   0xe   : > { %p1464_p9 = pnand %p1463_p8, %p1462_p7 }
  0x10   : > { %p1465_p10 = pneg %p1464_p9 }
  0x12   : > { %p1472_p0 = pnand %p1471_p13, %p1465_p10 }
  0x14   : > { %1475 = shalt.err (!%p1472_p0)
}
  0x15   : > { %s1504_s8 = smov [#allocation2]   ;;  %268 = sbr.rel (%p1562_p3) target bundleno = 706 (0x2c2), region = 40 }
  0x16   : > { %1376 = dma.vmem_to_smem (!%p1374_p6), %s235_s30, 16, %s1504_s8, [#allocation3]  }
  0x1c   : > { %1489 = dma.done.wait (%p1566_p4), [#allocation3], 16  }
  0x1d   : > { %1491 = vsyncadd (%p1566_p4), [#allocation3], 4294967280 }
  0x1e   : > { %274 = sfence }
  0x1f   : > { %v360_v0 = vld [vmem:[%s1844_s2] sm:$0xff]  ;;  %v361_v1 = vld [vmem:[%s1844_s2 + $0x8] sm:$0xff]  ;;  %p314_p1 = scmp.lt.s32.totalorder %s1494_s21, 1  ;;  %vm366_vm0 = vcmask 130048   ;;  %v358_v19 = vld [vmem:[%s1843_s1 + $0x10] sm:$0xff]  ;;  %s601_s29 = sld [smem:[#allocation2]] }
  0x20   : > { %v1349_v2 = vpack.c.bf16 %v361_v1, %v360_v0  ;;  %v356_v11 = vld [vmem:[%s1843_s1] sm:$0xff]  ;;  %v357_v17 = vld [vmem:[%s1843_s1 + $0x8] sm:$0xff]  ;;  %v359_v22 = vld [vmem:[%s1843_s1 + $0x18] sm:$0xff]  ;;  %s1244_s10 = sld [smem:[#allocation2 + $0x1]]  ;;  %s1249_s11 = sld [smem:[#allocation2 + $0x2]]  ;;  %vm1040_vm8 = vcmask 261120  }
  0x21   : > { %s1866_s21 = smov (!%p314_p1, %s1494_s21), 1  ;;  %1313 = vmatprep.mubr.msk.f32.mxu1 %vm366_vm0, %v356_v11  ;;  %s1254_s12 = sld [smem:[#allocation2 + $0x3]] }
  0x22   : > { %1350 = vmatprep.subr.bf16.mxu0 %v1349_v2  ;;  %s1257_s13 = sshll.u32 %s1866_s21, 6  ;;  %s1258_s30 = sshll.u32 %s1866_s21, 5 }
  0x23   : > { %1352 = vmatpush3.bf16.msra.mxu0 %v1349_v2  ;;  %s318_s16 = scalar_lea.vmem %s1842_s0, %s1257_s13  ;;  %s333_s9 = scalar_lea.vmem %s1845_s3, %s1258_s30 }
  0x24   : > { %v348_v3 = vld [vmem:[%s318_s16] sm:$0xff]  ;;  %v349_v4 = vld [vmem:[%s318_s16 + $0x8] sm:$0xff]  ;;  %v350_v5 = vld [vmem:[%s318_s16 + $0x10] sm:$0xff]  ;;  %s340_s15 = scalar_lea.vmem %s1848_s6, %s1866_s21  ;;  %s337_s18 = scalar_lea.vmem %s1847_s5, %s1866_s21 }
  0x25   : > { %1297 = vmatprep.mubr.msk.f32.mxu0 %vm366_vm0, %v348_v3  ;;  %v351_v6 = vld [vmem:[%s318_s16 + $0x18] sm:$0xff]  ;;  %v352_v7 = vld [vmem:[%s318_s16 + $0x20] sm:$0xff]  ;;  %v353_v8 = vld [vmem:[%s318_s16 + $0x28] sm:$0xff]  ;;  %v602_v28 = vstv %s601_s29 }
  0x26   : > { %1298 = vmatmul.mubr.msk.f32.vlgmr.msra.gmra.mrb[0].mxu0 %vm366_vm0, %v349_v4  ;;  %v354_v9 = vld [vmem:[%s318_s16 + $0x30] sm:$0xff]  ;;  %v355_v10 = vld [vmem:[%s318_s16 + $0x38] sm:$0xff]  ;;  %v1637_v27 = vld [vmem:[%s333_s9] sm:$0xff]  ;;  %v733_v31 = vstv %s1244_s10 }
  0x27   : > { %1300 = vmatprep.mubr.msk.f32.mxu0 %vm366_vm0, %v350_v5  ;;  %vm593_vm1 = vcmp.eq.s32.totalorder %v1637_v27, 0  ;;  %v1640_v29 = vld [vmem:[%s333_s9 + $0x8] sm:$0xff]  ;;  %vm724_vm2 = vcmp.eq.s32.totalorder %v1637_v27, 1  ;;  %vm859_vm4 = vcmp.eq.s32.totalorder %v1637_v27, 2  ;;  %v868_v33 = vstv %s1249_s11  ;;  %v1651_v35 = vld [vmem:[%s333_s9 + $0x10] sm:$0xff]  ;;  %v1670_v42 = vld [vmem:[%s333_s9 + $0x18] sm:$0xff] }
  0x28   : > { %v603_v30 = vsel %vm593_vm1, %v602_v28, 0.0  ;;  %vm594_vm3 = vcmp.eq.s32.totalorder %v1640_v29, 0  ;;  %vm1851_vm5 = vcmp.eq.s32.totalorder %v1637_v27, 3  ;;  %v1003_v37 = vstv %s1254_s12 }
  0x29   : > { %v734_v32 = vsel %vm724_vm2, %v733_v31, %v603_v30  ;;  %v604_v34 = vsel %vm594_vm3, %v602_v28, 0.0  ;;  %vm1849_vm6 = vcmp.ne.s32.totalorder %v1637_v27, 255  ;;  %vm725_vm7 = vcmp.eq.s32.totalorder %v1640_v29, 1 }
  0x2a   : > { %1301 = vmatmul.mubr.msk.f32.gmra.mrb[2].mxu0 %vm366_vm0, %v351_v6  ;;  %v869_v36 = vsel %vm859_vm4, %v868_v33, %v734_v32  ;;  %vm595_vm9 = vcmp.eq.s32.totalorder %v1651_v35, 0  ;;  %vm860_vm10 = vcmp.eq.s32.totalorder %v1640_v29, 2  ;;  %v735_v41 = vsel %vm725_vm7, %v733_v31, %v604_v34 }
  0x2b   : > { %1303 = vmatprep.mubr.msk.f32.mxu0 %vm366_vm0, %v352_v7  ;;  %v1658_v38 = vsel %vm1851_vm5, %v1003_v37, %v869_v36  ;;  %v605_v43 = vsel %vm595_vm9, %v602_v28, 0.0  ;;  %vm1852_vm11 = vcmp.eq.s32.totalorder %v1640_v29, 3  ;;  %v870_v44 = vsel %vm860_vm10, %v868_v33, %v735_v41 }
  0x2c   : > { %v1036_v39 = vsel %vm1849_vm6, %v1658_v38, 0.0  ;;  %v1679_v45 = vsel %vm1852_vm11, %v1003_v37, %v870_v44  ;;  %vm1850_vm12 = vcmp.ne.s32.totalorder %v1640_v29, 255  ;;  %vm726_vm13 = vcmp.eq.s32.totalorder %v1651_v35, 1 }
  0x2d   : > { %v1062_v40 = vsel %vm1040_vm8, %v1036_v39, 0.0  ;;  %v1037_v46 = vsel %vm1850_vm12, %v1679_v45, 0.0  ;;  %vm596_vm14 = vcmp.eq.s32.totalorder %v1670_v42, 0  ;;  %vm861_vm15 = vcmp.eq.s32.totalorder %v1651_v35, 2 }
  0x2e   : > { %1304 = vmatmul.mubr.msk.f32.gmra.mrb[4].mxu0 %vm366_vm0, %v353_v8  ;;  %1063 = vadd.xlane.f32.xlu1 %v1062_v40  ;;  %v1065_v47 = vsel %vm1040_vm8, %v1037_v46, 0.0  ;;  %v736_v48 = vsel %vm726_vm13, %v733_v31, %v605_v43  ;;  %v606_v49 = vsel %vm596_vm14, %v602_v28, 0.0  ;;  %vm1010_vm6 = vcmp.ne.s32.totalorder %v1651_v35, 255 }
  0x2f   : > { %1306 = vmatprep.mubr.msk.f32.mxu0 %vm366_vm0, %v354_v9  ;;  %v871_v50 = vsel %vm861_vm15, %v868_v33, %v736_v48  ;;  %vm727_vm12 = vcmp.eq.s32.totalorder %v1670_v42, 1  ;;  %vm862_vm5 = vcmp.eq.s32.totalorder %v1670_v42, 2  ;;  %vm997_vm11 = vcmp.eq.s32.totalorder %v1670_v42, 3 }
  0x30   : > { %v737_v54 = vsel %vm727_vm12, %v733_v31, %v606_v49 }
  0x31   : > { %v872_v55 = vsel %vm862_vm5, %v868_v33, %v737_v54 }
  0x32   : > { %1307 = vmatmul.mubr.msk.f32.gmra.mrb[6].mxu0 %vm366_vm0, %v355_v10  ;;  %1066 = vadd.xlane.f32.xlu1 %v1065_v47  ;;  %v1714_v56 = vsel %vm997_vm11, %v1003_v37, %v872_v55 }
  0x33   : > { %1333 = vmatprep.mubr.msk.f32.mxu0 %vm366_vm0, %v356_v11 }
  0xf9   : > { %v1299_v12 = vpop.f32.mrb[0].mxu0 }
  0xfa   : > { %v457_v13 = vpop.f32.mrb[1].mxu0 }
  0xfb   : > { %v1353_v14 = vpack.c.bf16 %v1299_v12, %v457_v13 }
  0xfd   : > { %v1302_v15 = vpop.f32.mrb[2].mxu0  ;;  %1354 = vmatprep.subr.bf16.mxu1 %v1353_v14 }
  0xfe   : > { %v467_v16 = vpop.f32.mrb[3].mxu0  ;;  %1356 = vmatpush3.bf16.msra.mxu1 %v1353_v14 }
  0xff   : > { %v1357_v18 = vpack.c.bf16 %v1302_v15, %v467_v16 }
 0x101   : > { %v1305_v20 = vpop.f32.mrb[4].mxu0  ;;  %1314 = vmatmul.mubr.msk.f32.vlgmr.msra.gmra.mrb[0].mxu1 %vm366_vm0, %v357_v17  ;;  %1358 = vmatprep.subr.bf16.mxu1 %v1357_v18 }
 0x102   : > { %v477_v21 = vpop.f32.mrb[5].mxu0  ;;  %1360 = vmatpush3.bf16.msra.mxu1 %v1357_v18  ;;  %1316 = vmatprep.mubr.msk.f32.mxu1 %vm366_vm0, %v358_v19 }
 0x103   : > { %v1361_v23 = vpack.c.bf16 %v1305_v20, %v477_v21 }
 0x105   : > { %1317 = vmatmul.mubr.msk.f32.gmra.mrb[2].mxu1 %vm366_vm0, %v359_v22  ;;  %1362 = vmatprep.subr.bf16.mxu0 %v1361_v23  ;;  %v1308_v24 = vpop.f32.mrb[6].mxu0 }
 0x106   : > { %1364 = vmatpush3.bf16.msra.mxu0 %v1361_v23  ;;  %1323 = vmatprep.mubr.msk.f32.mxu1 %vm366_vm0, %v356_v11  ;;  %v487_v25 = vpop.f32.mrb[7].mxu0 }
 0x107   : > { %v1365_v26 = vpack.c.bf16 %v1308_v24, %v487_v25 }
 0x109   : > { %1324 = vmatmul.mubr.msk.f32.vlgmr.msra.gmra.mrb[4].mxu1 %vm366_vm0, %v357_v17  ;;  %1334 = vmatmul.mubr.msk.f32.vlgmr.msra.gmra.mrb[8].mxu0 %vm366_vm0, %v357_v17 }
 0x10a   : > { %1326 = vmatprep.mubr.msk.f32.mxu1 %vm366_vm0, %v358_v19  ;;  %1366 = vmatprep.subr.bf16.mxu1 %v1365_v26 }
 0x10b   : > { %1336 = vmatprep.mubr.msk.f32.mxu0 %vm366_vm0, %v358_v19  ;;  %1368 = vmatpush3.bf16.msra.mxu1 %v1365_v26 }
 0x10d   : > { %1327 = vmatmul.mubr.msk.f32.gmra.mrb[6].mxu1 %vm366_vm0, %v359_v22  ;;  %1337 = vmatmul.mubr.msk.f32.gmra.mrb[10].mxu0 %vm366_vm0, %v359_v22 }
 0x10e   : > { %1343 = vmatprep.mubr.msk.f32.mxu1 %vm366_vm0, %v356_v11 }
 0x111   : > { %1344 = vmatmul.mubr.msk.f32.vlgmr.msra.gmra.mrb[8].mxu1 %vm366_vm0, %v357_v17 }
 0x112   : > { %1346 = vmatprep.mubr.msk.f32.mxu1 %vm366_vm0, %v358_v19 }
 0x115   : > { %1347 = vmatmul.mubr.msk.f32.gmra.mrb[10].mxu1 %vm366_vm0, %v359_v22  ;;  %vm1853_vm0 = vcmp.eq.s32.totalorder %v1651_v35, 3 }
 0x116   : > { %v1698_v51 = vsel %vm1853_vm0, %v1003_v37, %v871_v50  ;;  %vm1011_vm0 = vcmp.ne.s32.totalorder %v1670_v42, 255 }
 0x117   : > { %v1038_v52 = vsel %vm1010_vm6, %v1698_v51, 0.0  ;;  %v1039_v57 = vsel %vm1011_vm0, %v1714_v56, 0.0 }
 0x118   : > { %v1068_v53 = vsel %vm1040_vm8, %v1038_v52, 0.0  ;;  %v1071_v58 = vsel %vm1040_vm8, %v1039_v57, 0.0 }
 0x119   : > { %1069 = vadd.xlane.f32.xlu1 %v1068_v53 }
 0x11d   : > { %1072 = vadd.xlane.f32.xlu1 %v1071_v58 }
 0x1d4   : > { %v1315_v59 = vpop.f32.mrb[0].mxu1 }
 0x1d5   : > { %v574_v60 = vpop.f32.mrb[1].mxu1  ;;  %v598_v63 = vsel %vm594_vm3, %v1315_v59, 0.0  ;;  %vm1858_vm3 = vcmp.eq.s32.totalorder %v1651_v35, 3 }
 0x1d6   : > { %v597_v2 = vsel %vm593_vm1, %v574_v60, 0.0  ;;  %vm1856_vm1 = vcmp.eq.s32.totalorder %v1640_v29, 3 }
 0x1d8   : > { %v1318_v61 = vpop.f32.mrb[2].mxu1 }
 0x1d9   : > { %v584_v62 = vpop.f32.mrb[3].mxu1  ;;  %v600_v7 = vsel %vm596_vm14, %v1318_v61, 0.0 }
 0x1da   : > { %v599_v15 = vsel %vm595_vm9, %v584_v62, 0.0 }
 0x1dc   : > { %v1325_v0 = vpop.f32.mrb[4].mxu1  ;;  %v1335_v1 = vpop.f32.mrb[8].mxu0 }
 0x1dd   : > { %v693_v3 = vmax.f32 %v1315_v59, %v1325_v0  ;;  %v729_v4 = vsel %vm725_vm7, %v1325_v0, %v598_v63  ;;  %v673_v5 = vpop.f32.mrb[5].mxu1  ;;  %v804_v6 = vpop.f32.mrb[9].mxu0 }
 0x1de   : > { %v692_v8 = vmax.f32 %v574_v60, %v673_v5  ;;  %v728_v9 = vsel %vm724_vm2, %v673_v5, %v597_v2  ;;  %v1733_v10 = vsel %vm860_vm10, %v1335_v1, %v729_v4  ;;  %vm1857_vm2 = vcmp.eq.s32.totalorder %v1637_v27, 3 }
 0x1df   : > { %v697_v11 = vsub.f32 %v1315_v59, %v693_v3  ;;  %v709_v12 = vsub.f32 %v1325_v0, %v693_v3  ;;  %v1735_v13 = vmax.f32 %v693_v3, %v1335_v1  ;;  %v863_v14 = vsel %vm859_vm4, %v804_v6, %v728_v9 }
 0x1e0   : > { %v696_v16 = vsub.f32 %v574_v60, %v692_v8  ;;  %v708_v17 = vsub.f32 %v673_v5, %v692_v8  ;;  %v1741_v18 = vmax.f32 %v692_v8, %v804_v6  ;;  %v1328_v19 = vpop.f32.mrb[6].mxu1  ;;  %v1338_v20 = vpop.f32.mrb[10].mxu0  ;;  %vm1859_vm4 = vcmp.ne.s32.totalorder %v1640_v29, 255 }
 0x1e1   : > { %v702_v21 = vmul.f32 1.442695, %v697_v11  ;;  %v714_v22 = vmul.f32 1.442695, %v709_v12  ;;  %v828_v23 = vsub.f32 %v693_v3, %v1735_v13  ;;  %v844_v24 = vsub.f32 %v1335_v1, %v1735_v13  ;;  %v683_v25 = vpop.f32.mrb[7].mxu1  ;;  %v814_v26 = vpop.f32.mrb[11].mxu0 }
 0x1e2   : > { %v700_v28 = vmul.f32 1.442695, %v696_v16  ;;  %v712_v30 = vmul.f32 1.442695, %v708_v17  ;;  %v827_v31 = vsub.f32 %v692_v8, %v1741_v18  ;;  %v843_v32 = vsub.f32 %v804_v6, %v1741_v18 }
 0x1e3   : > { %1405 = vpow2.f32 %v702_v21  ;;  %v833_v33 = vmul.f32 1.442695, %v828_v23  ;;  %v849_v34 = vmul.f32 1.442695, %v844_v24  ;;  %v695_v36 = vmax.f32 %v1318_v61, %v1328_v19 }
 0x1e4   : > { %1407 = vpow2.f32 %v714_v22  ;;  %v831_v37 = vmul.f32 1.442695, %v827_v31  ;;  %v847_v39 = vmul.f32 1.442695, %v843_v32  ;;  %v731_v40 = vsel %vm727_vm12, %v1328_v19, %v600_v7  ;;  %v1345_v41 = vpop.f32.mrb[8].mxu1 }
 0x1e5   : > { %1409 = vpow2.f32 %v700_v28  ;;  %v699_v43 = vsub.f32 %v1318_v61, %v695_v36  ;;  %v711_v44 = vsub.f32 %v1328_v19, %v695_v36  ;;  %v694_v46 = vmax.f32 %v584_v62, %v683_v25  ;;  %v939_v47 = vpop.f32.mrb[9].mxu1 }
 0x1e6   : > { %1411 = vpow2.f32 %v712_v30  ;;  %v730_v48 = vsel %vm726_vm13, %v683_v25, %v599_v15  ;;  %v826_v49 = vmax.f32 %v695_v36, %v1338_v20  ;;  %v866_v50 = vsel %vm862_vm5, %v1338_v20, %v731_v40 }
 0x1e7   : > { %1413 = vpow2.f32 %v833_v33  ;;  %v706_v52 = vmul.f32 1.442695, %v699_v43  ;;  %v718_v53 = vmul.f32 1.442695, %v711_v44  ;;  %v698_v54 = vsub.f32 %v584_v62, %v694_v46 }
 0x1e8   : > { %1415 = vpow2.f32 %v849_v34  ;;  %v710_v55 = vsub.f32 %v683_v25, %v694_v46  ;;  %v830_v57 = vsub.f32 %v695_v36, %v826_v49  ;;  %v846_v58 = vsub.f32 %v1338_v20, %v826_v49  ;;  %v1348_v59 = vpop.f32.mrb[10].mxu1 }
 0x1e9   : > { %1417 = vpow2.f32 %v831_v37  ;;  %v704_v60 = vmul.f32 1.442695, %v698_v54  ;;  %v825_v61 = vmax.f32 %v694_v46, %v814_v26  ;;  %v865_v63 = vsel %vm861_vm15, %v814_v26, %v730_v48  ;;  %v1755_v0 = vpop.f32.mrb[11].mxu1 }
 0x1ea   : > { %1419 = vpow2.f32 %v847_v39  ;;  %v716_v1 = vmul.f32 1.442695, %v710_v55  ;;  %v837_v2 = vmul.f32 1.442695, %v830_v57  ;;  %v853_v3 = vmul.f32 1.442695, %v846_v58 }
 0x1eb   : > { %1421 = vpow2.f32 %v706_v52  ;;  %v829_v4 = vsub.f32 %v694_v46, %v825_v61  ;;  %v845_v62 = vsub.f32 %v814_v26, %v825_v61  ;;  %v1758_v5 = vmax.f32 %v1735_v13, %v1345_v41 }
 0x1ec   : > { %1423 = vpow2.f32 %v718_v53  ;;  %v1763_v6 = vsel %vm1856_vm1, %v1345_v41, %v1733_v10  ;;  %v1766_v7 = vmax.f32 %v1741_v18, %v939_v47  ;;  %v1770_v8 = vsel %vm1857_vm2, %v939_v47, %v863_v14 }
 0x1ed   : > { %v1406_v9 = vpop.eup %1405  ;;  %1425 = vpow2.f32 %v704_v60  ;;  %v835_v11 = vmul.f32 1.442695, %v829_v4  ;;  %v851_v12 = vmul.f32 1.442695, %v845_v62  ;;  %v963_v15 = vsub.f32 %v1735_v13, %v1758_v5 }
 0x1ee   : > { %v1408_v16 = vpop.eup %1407  ;;  %1427 = vpow2.f32 %v716_v1  ;;  %v979_v17 = vsub.f32 %v1345_v41, %v1758_v5  ;;  %v962_v10 = vsub.f32 %v1741_v18, %v1766_v7  ;;  %v978_v19 = vsub.f32 %v939_v47, %v1766_v7 }
 0x1ef   : > { %v1410_v20 = vpop.eup %1409  ;;  %v721_v21 = vadd.f32 %v1408_v16, %v1406_v9  ;;  %1429 = vpow2.f32 %v837_v2  ;;  %v968_v14 = vmul.f32 1.442695, %v963_v15  ;;  %v1778_v22 = vmax.f32 %v826_v49, %v1348_v59 }
 0x1f0   : > { %v1412_v23 = vpop.eup %1411  ;;  %1431 = vpow2.f32 %v853_v3  ;;  %v984_v24 = vmul.f32 1.442695, %v979_v17  ;;  %v966_v25 = vmul.f32 1.442695, %v962_v10  ;;  %v982_v13 = vmul.f32 1.442695, %v978_v19 }
 0x1f1   : > { %v1414_v26 = vpop.eup %1413  ;;  %v720_v28 = vadd.f32 %v1412_v23, %v1410_v20  ;;  %1433 = vpow2.f32 %v835_v11  ;;  %v965_v30 = vsub.f32 %v826_v49, %v1778_v22  ;;  %v981_v18 = vsub.f32 %v1348_v59, %v1778_v22 }
 0x1f2   : > { %v1416_v31 = vpop.eup %1415  ;;  %v840_v32 = vmul.f32 %v1414_v26, %v721_v21  ;;  %1435 = vpow2.f32 %v851_v12  ;;  %v1784_v33 = vsel %vm997_vm11, %v1348_v59, %v866_v50  ;;  %v1787_v34 = vmax.f32 %v825_v61, %v1755_v0 }
 0x1f3   : > { %v1418_v36 = vpop.eup %1417  ;;  %1437 = vpow2.f32 %v968_v14  ;;  %v972_v37 = vmul.f32 1.442695, %v965_v30  ;;  %v988_v39 = vmul.f32 1.442695, %v981_v18  ;;  %v1792_v40 = vsel %vm1858_vm3, %v1755_v0, %v865_v63 }
 0x1f4   : > { %v1420_v41 = vpop.eup %1419  ;;  %v856_v43 = vadd.f32 %v1416_v31, %v840_v32  ;;  %v839_v44 = vmul.f32 %v1418_v36, %v720_v28  ;;  %1439 = vpow2.f32 %v984_v24  ;;  %v964_v46 = vsub.f32 %v825_v61, %v1787_v34 }
 0x1f5   : > { %v1422_v47 = vpop.eup %1421  ;;  %1441 = vpow2.f32 %v966_v25  ;;  %v980_v48 = vsub.f32 %v1755_v0, %v1787_v34  ;;  %vm1860_vm5 = vcmp.ne.s32.totalorder %v1637_v27, 255 }
 0x1f6   : > { %v1424_v49 = vpop.eup %1423  ;;  %v855_v50 = vadd.f32 %v1420_v41, %v839_v44  ;;  %1443 = vpow2.f32 %v982_v13  ;;  %v970_v52 = vmul.f32 1.442695, %v964_v46 }
 0x1f7   : > { %v1426_v53 = vpop.eup %1425  ;;  %v723_v54 = vadd.f32 %v1424_v49, %v1422_v47  ;;  %1445 = vpow2.f32 %v972_v37  ;;  %v986_v55 = vmul.f32 1.442695, %v980_v48 }
 0x1f8   : > { %v1428_v57 = vpop.eup %1427  ;;  %1447 = vpow2.f32 %v988_v39 }
 0x1f9   : > { %v1430_v58 = vpop.eup %1429  ;;  %v722_v59 = vadd.f32 %v1428_v57, %v1426_v53  ;;  %1449 = vpow2.f32 %v970_v52  ;;  %v1505_v57 = vmov 0.0  }
 0x1fa   : > { %v1432_v60 = vpop.eup %1431  ;;  %v842_v61 = vmul.f32 %v1430_v58, %v723_v54  ;;  %1451 = vpow2.f32 %v986_v55 }
 0x1fb   : > { %v1434_v63 = vpop.eup %1433 }
 0x1fc   : > { %v1436_v1 = vpop.eup %1435  ;;  %v858_v2 = vadd.f32 %v1432_v60, %v842_v61  ;;  %v841_v0 = vmul.f32 %v1434_v63, %v722_v59 }
 0x1fd   : > { %v1438_v3 = vpop.eup %1437 }
 0x1fe   : > { %v1440_v4 = vpop.eup %1439  ;;  %v857_v62 = vadd.f32 %v1436_v1, %v841_v0  ;;  %v975_v9 = vmul.f32 %v1438_v3, %v856_v43 }
 0x1ff   : > { %v1442_v11 = vpop.eup %1441 }
 0x200   : > { %v1444_v12 = vpop.eup %1443  ;;  %v991_v15 = vadd.f32 %v1440_v4, %v975_v9  ;;  %v974_v16 = vmul.f32 %v1442_v11, %v855_v50 }
 0x201   : > { %v1446_v17 = vpop.eup %1445 }
 0x202   : > { %v1448_v10 = vpop.eup %1447  ;;  %1453 = vlog2.f32 %v991_v15  ;;  %v990_v19 = vadd.f32 %v1444_v12, %v974_v16  ;;  %v977_v20 = vmul.f32 %v1446_v17, %v858_v2 }
 0x203   : > { %v1450_v21 = vpop.eup %1449 }
 0x204   : > { %1455 = vlog2.f32 %v990_v19  ;;  %v993_v14 = vadd.f32 %v1448_v10, %v977_v20  ;;  %v976_v23 = vmul.f32 %v1450_v21, %v857_v62  ;;  %v1452_v24 = vpop.eup %1451 }
 0x206   : > { %1457 = vlog2.f32 %v993_v14  ;;  %v992_v25 = vadd.f32 %v1452_v24, %v976_v23 }
 0x208   : > { %1459 = vlog2.f32 %v992_v25 }
 0x20c   : > { %v1454_v13 = vpop.eup %1453 }
 0x20d   : > { %v1015_v26 = vmul.f32 0.6931472, %v1454_v13 }
 0x20e   : > { %v1456_v28 = vpop.eup %1455 }
 0x20f   : > { %v1021_v30 = vadd.f32 %v1015_v26, %v1758_v5  ;;  %v1013_v18 = vmul.f32 0.6931472, %v1456_v28 }
 0x210   : > { %v1458_v31 = vpop.eup %1457 }
 0x211   : > { %v1025_v32 = vsub.f32 %v1021_v30, %v1763_v6  ;;  %v1020_v36 = vadd.f32 %v1013_v18, %v1766_v7  ;;  %v1019_v37 = vmul.f32 0.6931472, %v1458_v31 }
 0x212   : > { %v1460_v39 = vpop.eup %1459 }
 0x213   : > { %v1024_v41 = vsub.f32 %v1020_v36, %v1770_v8  ;;  %v1023_v43 = vadd.f32 %v1019_v37, %v1778_v22  ;;  %v1017_v44 = vmul.f32 0.6931472, %v1460_v39  ;;  %v1029_v46 = vmul.f32 %v1025_v32, %v1679_v45  ;;  %v1064_v22 = vpop.xlane.xlu1 %1063 }
 0x215   : > { %v1027_v47 = vsub.f32 %v1023_v43, %v1784_v33  ;;  %v1022_v48 = vadd.f32 %v1017_v44, %v1787_v34  ;;  %v1028_v5 = vmul.f32 %v1024_v41, %v1658_v38  ;;  %v1033_v6 = vsel %vm1859_vm4, %v1029_v46, 0.0 }
 0x216   : > { %v1044_v7 = vsel %vm1040_vm8, %v1033_v6, 0.0 }
 0x217   : > { %v1026_v49 = vsub.f32 %v1022_v48, %v1792_v40  ;;  %1045 = vadd.xlane.f32.xlu0 %v1044_v7  ;;  %v1032_v8 = vsel %vm1860_vm5, %v1028_v5, 0.0  ;;  %v1031_v29 = vmul.f32 %v1027_v47, %v1714_v56  ;;  %v1067_v34 = vpop.xlane.xlu1 %1066 }
 0x218   : > { %v1041_v33 = vsel %vm1040_vm8, %v1032_v8, 0.0  ;;  %v1074_v40 = vadd.f32 %v1067_v34, %v1064_v22 }
 0x219   : > { %v1030_v45 = vmul.f32 %v1026_v49, %v1698_v51  ;;  %v1035_v27 = vsel %vm1011_vm0, %v1031_v29, 0.0 }
 0x21a   : > { %v1050_v51 = vsel %vm1040_vm8, %v1035_v27, 0.0 }
 0x21b   : > { %1042 = vadd.xlane.f32.xlu0 %v1041_v33  ;;  %v1034_v38 = vsel %vm1010_vm6, %v1030_v45, 0.0  ;;  %v1070_v52 = vpop.xlane.xlu1 %1069  ;;  %vm345_vm6 = vcmask 0  }
 0x21c   : > { %v1047_v50 = vsel %vm1040_vm8, %v1034_v38, 0.0  ;;  %v1075_v53 = vadd.f32 %v1074_v40, %v1070_v52  ;;  %347 = vst.msk [vmem:[%s340_s15] sm:$0x1] %vm345_vm6, %v1505_v57  ;;  %346 = vst.msk [vmem:[%s337_s18] sm:$0x1] %vm345_vm6, %v1505_v57 }
 0x21f   : > { %1048 = vadd.xlane.f32.xlu0 %v1047_v50  ;;  %v1073_v54 = vpop.xlane.xlu1 %1072 }
 0x220   : > { %v1076_v55 = vadd.f32 %v1075_v53, %v1073_v54 }
 0x222   : > { %v1077_v35 = vrot.slane %v1076_v55, 4 }
 0x223   : > { %1051 = vadd.xlane.f32.xlu0 %v1050_v51  ;;  %v1087_v60 = vld [vmem:[%s340_s15] sm:$0x1] }
 0x224   : > { %v1078_v56 = vadd.f32 %v1077_v35, %v1076_v55  ;;  %v1083_v10 = vld [vmem:[%s337_s18] sm:$0x1] }
 0x226   : > { %v1079_v42 = vrot.slane %v1078_v56, 2 }
 0x228   : > { %v1080_v58 = vadd.f32 %v1079_v42, %v1078_v56 }
 0x22a   : > { %v1081_v59 = vrot.slane %v1080_v58, 1 }
 0x22c   : > { %v1082_v61 = vadd.f32 %v1081_v59, %v1080_v58 }
 0x22e   : > { %v1088_v63 = vadd.f32 %v1087_v60, %v1082_v61 }
 0x230   : > { %1089 = vst.msk [vmem:[%s340_s15] sm:$0x1] %vm345_vm6, %v1088_v63 }
 0x2a4   : > { %v1046_v1 = vpop.xlane.xlu0 %1045 }
 0x2a8   : > { %v1043_v2 = vpop.xlane.xlu0 %1042 }
 0x2a9   : > { %v1053_v3 = vadd.f32 %v1046_v1, %v1043_v2 }
 0x2ac   : > { %v1049_v0 = vpop.xlane.xlu0 %1048 }
 0x2ad   : > { %v1054_v4 = vadd.f32 %v1053_v3, %v1049_v0 }
 0x2b0   : > { %v1052_v62 = vpop.xlane.xlu0 %1051 }
 0x2b1   : > { %v1055_v9 = vadd.f32 %v1054_v4, %v1052_v62 }
 0x2b3   : > { %v1056_v11 = vrot.slane %v1055_v9, 4 }
 0x2b5   : > { %v1057_v12 = vadd.f32 %v1056_v11, %v1055_v9 }
 0x2b7   : > { %v1058_v15 = vrot.slane %v1057_v12, 2 }
 0x2b9   : > { %v1059_v16 = vadd.f32 %v1058_v15, %v1057_v12 }
 0x2bb   : > { %v1060_v17 = vrot.slane %v1059_v16, 1 }
 0x2bd   : > { %v1061_v19 = vadd.f32 %v1060_v17, %v1059_v16 }
 0x2bf   : > { %v1084_v20 = vadd.f32 %v1083_v10, %v1061_v19 }
 0x2c1   : > { %1086 = vst.msk [vmem:[%s337_s18] sm:$0x1] %vm345_vm6, %v1084_v20 }
 0x2c2 PF: > { %s18_s23 = sadd.s32 1, %s1502_s23   ;;  %s1861_s21 = smov %s1498_s22 }
 0x2c3   : > { %p15_p2 = scmp.ge.s32.totalorder %s18_s23, 4   ;;  %s1862_s22 = smov %s1864_s25 }
 0x2c5   :  { %17 = sbr.rel (!%p15_p2) target bundleno = 2 (0x2), region = 97 }
 0x2cc   :  { %1119 = vsyncpa [#allocation3], 1 }
 0x2cd   :  { %1121 = vsyncpa [#allocation3 + $0x1], 1 }

</bundles_post_ra>
